<compile_context>
chip_gen: v5e
topology: v5e:2x2
jax: 0.10.0
libtpu: 0.0.40
codegen_flags: <defaults>
</compile_context>

<pallas_src>
import jax
import jax.numpy as jnp
from jax.experimental import pallas as pl
from jax.experimental.pallas import tpu as pltpu

_LANE = 128          # lane width (last-dim tiling unit)
_SUBLANE = 8         # f32 sublane width (second-to-last dim tiling unit)
_MAX_BATCH_TILE = 256
_NEG_BIG = -1e30     # bias for padded logit columns -> exp() == 0


def _round_up(n: int, m: int) -> int:
    return ((n + m - 1) // m) * m


def policy_net_kernel(x_ref, w1_ref, b1_ref, w2_ref, b2_ref, w3_ref, b3_ref,
                      out_ref):
    """Fused  relu(x@W1+b1) -> relu(.@W2+b2) -> softmax(.@W3+b3, axis=-1)."""
    x = x_ref[...]                                             # (tb, S_pad)

    # l1 + ReLU
    h1 = jnp.dot(x, w1_ref[...], preferred_element_type=jnp.float32)
    h1 = jnp.maximum(h1 + b1_ref[...], 0.0)                    # bias (1,H) bcast

    # l2 + ReLU
    h2 = jnp.dot(h1, w2_ref[...], preferred_element_type=jnp.float32)
    h2 = jnp.maximum(h2 + b2_ref[...], 0.0)

    # l3 + softmax over the (padded) feature axis.  Padded columns carry a
    # -1e30 bias, so exp() underflows to 0 and they do not affect the denom.
    logits = jnp.dot(h2, w3_ref[...], preferred_element_type=jnp.float32)
    logits = logits + b3_ref[...]                              # (tb, A_pad)
    m = jnp.max(logits, axis=-1, keepdims=True)
    e = jnp.exp(logits - m)
    denom = jnp.sum(e, axis=-1, keepdims=True)
    inv = pl.reciprocal(denom, approx=True)                    # EUP slot
    inv = inv * (2.0 - denom * inv)                            # Newton: ~exact f32
    out_ref[...] = (e * inv).astype(out_ref.dtype)


@jax.jit
def policy_net_forward(x, w1, b1, w2, b2, w3, b3):
    # Mirror the PyTorch forward's unsqueeze for 1-D inputs.
    if x.ndim == 1:
        x = x[None, :]

    B, S = x.shape
    H = w1.shape[1]
    A = w3.shape[1]

    # ---- lane/sublane-friendly padded shapes --------------------------------
    S_pad = _round_up(S, _LANE)
    H_pad = _round_up(H, _LANE)
    A_pad = _round_up(A, _LANE)
    tb = min(_MAX_BATCH_TILE, _round_up(B, _SUBLANE))   # batch tile
    B_pad = _round_up(B, tb)

    f32 = jnp.float32
    x_p = jnp.pad(x.astype(f32), ((0, B_pad - B), (0, S_pad - S)))
    w1_p = jnp.pad(w1.astype(f32), ((0, S_pad - S), (0, H_pad - H)))
    w2_p = jnp.pad(w2.astype(f32), ((0, H_pad - H), (0, H_pad - H)))
    w3_p = jnp.pad(w3.astype(f32), ((0, H_pad - H), (0, A_pad - A)))
    b1_p = jnp.pad(b1.astype(f32).reshape(1, H), ((0, 0), (0, H_pad - H)))
    b2_p = jnp.pad(b2.astype(f32).reshape(1, H), ((0, 0), (0, H_pad - H)))
    b3_p = jnp.pad(b3.astype(f32).reshape(1, A), ((0, 0), (0, A_pad - A)),
                   constant_values=_NEG_BIG)

    # Weights / biases: constant index_map -> VMEM-resident across batch blocks.
    resident = lambda shape: pl.BlockSpec(shape, lambda i: (0, 0))

    out_pad = pl.pallas_call(
        policy_net_kernel,
        out_shape=jax.ShapeDtypeStruct((B_pad, A_pad), jnp.float32),
        grid=(B_pad // tb,),
        in_specs=[
            pl.BlockSpec((tb, S_pad), lambda i: (i, 0)),        # x: batch-tiled
            resident((S_pad, H_pad)), resident((1, H_pad)),     # W1, b1
            resident((H_pad, H_pad)), resident((1, H_pad)),     # W2, b2
            resident((H_pad, A_pad)), resident((1, A_pad)),     # W3, b3
        ],
        out_specs=pl.BlockSpec((tb, A_pad), lambda i: (i, 0)),
        compiler_params=pltpu.CompilerParams(
            dimension_semantics=("parallel",)),                 # megacore on v7x
    )(x_p, w1_p, b1_p, w2_p, b2_p, w3_p, b3_p)

    return out_pad[:B, :A]


def init_params(key, state_size, hidden_dim, action_size):
    """Deterministic PyTorch-style (uniform +/- 1/sqrt(fan_in)) init."""
    ks = jax.random.split(key, 6)

    def linear(kw, kb, fan_in, fan_out):
        bound = 1.0 / jnp.sqrt(jnp.asarray(fan_in, jnp.float32))
        w = jax.random.uniform(kw, (fan_in, fan_out), jnp.float32, -bound, bound)
        b = jax.random.uniform(kb, (1, fan_out), jnp.float32, -bound, bound)
        return w, b

    w1, b1 = linear(ks[0], ks[1], state_size, hidden_dim)
    w2, b2 = linear(ks[2], ks[3], hidden_dim, hidden_dim)
    w3, b3 = linear(ks[4], ks[5], hidden_dim, action_size)
    return w1, b1, w2, b2, w3, b3


def _reference(x, w1, b1, w2, b2, w3, b3):
    if x.ndim == 1:
        x = x[None, :]
    h = jnp.maximum(x @ w1 + b1, 0.0)
    h = jnp.maximum(h @ w2 + b2, 0.0)
    return jax.nn.softmax(h @ w3 + b3, axis=1)


if __name__ == "__main__":
    # Small shapes implied by the module: x is (batch, state_size).
    batch = 2
    state_size = 16
    hidden_dim = 32     # CFG_DICT['ACTOR_CRITIC']['POLICY_HIDDEN_DIM'] stand-in
    action_size = 8

    key = jax.random.PRNGKey(0)
    kx, kp, kx2 = jax.random.split(key, 3)
    x = jax.random.normal(kx, (batch, state_size), jnp.float32)
    params = init_params(kp, state_size, hidden_dim, action_size)

    # --- small-batch path (single grid step) ---------------------------------
    out = jax.block_until_ready(policy_net_forward(x, *params))
    ref = _reference(x, *params)
    assert out.shape == (batch, action_size)
    assert jnp.allclose(out, ref, atol=1e-5, rtol=1e-5)
    assert jnp.allclose(jnp.sum(out, axis=1), 1.0, atol=1e-5)

    # --- 1-D input path (matches the torch unsqueeze branch) -----------------
    out1 = jax.block_until_ready(policy_net_forward(x[0], *params))
    assert out1.shape == (1, action_size)
    assert jnp.allclose(out1, ref[:1], atol=1e-5, rtol=1e-5)

    # --- larger batch: exercises multi-block parallel grid + resident weights -
    big_b = 300
    xb = jax.random.normal(kx2, (big_b, state_size), jnp.float32)
    outb = jax.block_until_ready(policy_net_forward(xb, *params))
    refb = _reference(xb, *params)
    assert outb.shape == (big_b, action_size)
    assert jnp.allclose(outb, refb, atol=1e-5, rtol=1e-5)
    assert jnp.allclose(jnp.sum(outb, axis=1), 1.0, atol=1e-5)

    print("KERNEL_OK")
</pallas_src>

<mosaic_0001>
module attributes {stable_mosaic.version = 11 : i64} {
  func.func @policy_net_kernel(%arg0: i32, %arg1: memref<8x128xf32, #tpu.memory_space<vmem>>, %arg2: memref<128x128xf32, #tpu.memory_space<vmem>>, %arg3: memref<1x128xf32, #tpu.memory_space<vmem>>, %arg4: memref<128x128xf32, #tpu.memory_space<vmem>>, %arg5: memref<1x128xf32, #tpu.memory_space<vmem>>, %arg6: memref<128x128xf32, #tpu.memory_space<vmem>>, %arg7: memref<1x128xf32, #tpu.memory_space<vmem>>, %arg8: memref<8x128xf32, #tpu.memory_space<vmem>>) attributes {dimension_semantics = [#tpu.dimension_semantics<parallel>], iteration_bounds = array<i64: 1>, scalar_prefetch = 0 : i64, scratch_operands = 0 : i64, tpu.core_type = #tpu.core_type<tc>, window_params = [{transform_indices = @transform_0, window_bounds = array<i64: 8, 128>}, {pipeline_mode = #tpu.pipeline_mode<synchronous>, transform_indices = @transform_1, window_bounds = array<i64: 128, 128>}, {pipeline_mode = #tpu.pipeline_mode<synchronous>, transform_indices = @transform_2, window_bounds = array<i64: 1, 128>}, {pipeline_mode = #tpu.pipeline_mode<synchronous>, transform_indices = @transform_3, window_bounds = array<i64: 128, 128>}, {pipeline_mode = #tpu.pipeline_mode<synchronous>, transform_indices = @transform_4, window_bounds = array<i64: 1, 128>}, {pipeline_mode = #tpu.pipeline_mode<synchronous>, transform_indices = @transform_5, window_bounds = array<i64: 128, 128>}, {pipeline_mode = #tpu.pipeline_mode<synchronous>, transform_indices = @transform_6, window_bounds = array<i64: 1, 128>}, {transform_indices = @transform_7, window_bounds = array<i64: 8, 128>}]} {
    %c0 = arith.constant 0 : index
    %c0_0 = arith.constant 0 : index
    %0 = vector.load %arg1[%c0, %c0_0] : memref<8x128xf32, #tpu.memory_space<vmem>>, vector<8x128xf32>
    %c0_1 = arith.constant 0 : index
    %c0_2 = arith.constant 0 : index
    %1 = vector.load %arg2[%c0_1, %c0_2] : memref<128x128xf32, #tpu.memory_space<vmem>>, vector<128x128xf32>
    %cst = arith.constant dense<0.000000e+00> : vector<8x128xf32>
    %2 = tpu.matmul %0, %1, %cst {dimension_numbers = #tpu.dot_dimension_numbers<[1], [0], [0], [1], [0, 0, 1, 1], [], []>} : vector<8x128xf32>, vector<128x128xf32>, vector<8x128xf32> -> vector<8x128xf32>
    %c0_3 = arith.constant 0 : index
    %c0_4 = arith.constant 0 : index
    %3 = vector.load %arg3[%c0_3, %c0_4] : memref<1x128xf32, #tpu.memory_space<vmem>>, vector<1x128xf32>
    %4 = vector.broadcast %3 : vector<1x128xf32> to vector<8x128xf32>
    %5 = arith.addf %2, %4 : vector<8x128xf32>
    %cst_5 = arith.constant 0.000000e+00 : f32
    %6 = vector.broadcast %cst_5 : f32 to vector<8x128xf32>
    %7 = arith.maximumf %5, %6 : vector<8x128xf32>
    %c0_6 = arith.constant 0 : index
    %c0_7 = arith.constant 0 : index
    %8 = vector.load %arg4[%c0_6, %c0_7] : memref<128x128xf32, #tpu.memory_space<vmem>>, vector<128x128xf32>
    %cst_8 = arith.constant dense<0.000000e+00> : vector<8x128xf32>
    %9 = tpu.matmul %7, %8, %cst_8 {dimension_numbers = #tpu.dot_dimension_numbers<[1], [0], [0], [1], [0, 0, 1, 1], [], []>} : vector<8x128xf32>, vector<128x128xf32>, vector<8x128xf32> -> vector<8x128xf32>
    %c0_9 = arith.constant 0 : index
    %c0_10 = arith.constant 0 : index
    %10 = vector.load %arg5[%c0_9, %c0_10] : memref<1x128xf32, #tpu.memory_space<vmem>>, vector<1x128xf32>
    %11 = vector.broadcast %10 : vector<1x128xf32> to vector<8x128xf32>
    %12 = arith.addf %9, %11 : vector<8x128xf32>
    %cst_11 = arith.constant 0.000000e+00 : f32
    %13 = vector.broadcast %cst_11 : f32 to vector<8x128xf32>
    %14 = arith.maximumf %12, %13 : vector<8x128xf32>
    %c0_12 = arith.constant 0 : index
    %c0_13 = arith.constant 0 : index
    %15 = vector.load %arg6[%c0_12, %c0_13] : memref<128x128xf32, #tpu.memory_space<vmem>>, vector<128x128xf32>
    %cst_14 = arith.constant dense<0.000000e+00> : vector<8x128xf32>
    %16 = tpu.matmul %14, %15, %cst_14 {dimension_numbers = #tpu.dot_dimension_numbers<[1], [0], [0], [1], [0, 0, 1, 1], [], []>} : vector<8x128xf32>, vector<128x128xf32>, vector<8x128xf32> -> vector<8x128xf32>
    %c0_15 = arith.constant 0 : index
    %c0_16 = arith.constant 0 : index
    %17 = vector.load %arg7[%c0_15, %c0_16] : memref<1x128xf32, #tpu.memory_space<vmem>>, vector<1x128xf32>
    %18 = vector.broadcast %17 : vector<1x128xf32> to vector<8x128xf32>
    %19 = arith.addf %16, %18 : vector<8x128xf32>
    %cst_17 = arith.constant dense<0xFF800000> : vector<8xf32>
    %20 = vector.multi_reduction <maximumf>, %19, %cst_17 [1] : vector<8x128xf32> to vector<8xf32>
    %21 = vector.shape_cast %20 : vector<8xf32> to vector<8x1xf32>
    %22 = vector.broadcast %21 : vector<8x1xf32> to vector<8x128xf32>
    %23 = arith.subf %19, %22 : vector<8x128xf32>
    %24 = math.exp %23 : vector<8x128xf32>
    %cst_18 = arith.constant dense<0.000000e+00> : vector<8xf32>
    %25 = vector.multi_reduction <add>, %24, %cst_18 [1] : vector<8x128xf32> to vector<8xf32>
    %26 = vector.shape_cast %25 : vector<8xf32> to vector<8x1xf32>
    %27 = tpu.reciprocal %26 {approx = true} : vector<8x1xf32> -> vector<8x1xf32>
    %28 = arith.mulf %26, %27 : vector<8x1xf32>
    %cst_19 = arith.constant 2.000000e+00 : f32
    %29 = vector.broadcast %cst_19 : f32 to vector<8x1xf32>
    %30 = arith.subf %29, %28 : vector<8x1xf32>
    %31 = arith.mulf %27, %30 : vector<8x1xf32>
    %32 = vector.broadcast %31 : vector<8x1xf32> to vector<8x128xf32>
    %33 = arith.mulf %24, %32 : vector<8x128xf32>
    %c0_20 = arith.constant 0 : index
    %c0_21 = arith.constant 0 : index
    %34 = vector.load %arg8[%c0_20, %c0_21] : memref<8x128xf32, #tpu.memory_space<vmem>>, vector<8x128xf32>
    tpu.vector_store %arg8[%c0_20, %c0_21], %33 {strides = array<i32>} : memref<8x128xf32, #tpu.memory_space<vmem>>, vector<8x128xf32>,
    return
  }
  func.func @transform_0(%arg0: i32) -> (i32, i32) {
    %c0_i32 = arith.constant 0 : i32
    %c0_i32_0 = arith.constant 0 : i32
    return %arg0, %c0_i32 : i32, i32
  }
  func.func @transform_1(%arg0: i32) -> (i32, i32) {
    %c0_i32 = arith.constant 0 : i32
    %c0_i32_0 = arith.constant 0 : i32
    %c0_i32_1 = arith.constant 0 : i32
    return %c0_i32, %c0_i32_0 : i32, i32
  }
  func.func @transform_2(%arg0: i32) -> (i32, i32) {
    %c0_i32 = arith.constant 0 : i32
    %c0_i32_0 = arith.constant 0 : i32
    %c0_i32_1 = arith.constant 0 : i32
    return %c0_i32, %c0_i32_0 : i32, i32
  }
  func.func @transform_3(%arg0: i32) -> (i32, i32) {
    %c0_i32 = arith.constant 0 : i32
    %c0_i32_0 = arith.constant 0 : i32
    %c0_i32_1 = arith.constant 0 : i32
    return %c0_i32, %c0_i32_0 : i32, i32
  }
  func.func @transform_4(%arg0: i32) -> (i32, i32) {
    %c0_i32 = arith.constant 0 : i32
    %c0_i32_0 = arith.constant 0 : i32
    %c0_i32_1 = arith.constant 0 : i32
    return %c0_i32, %c0_i32_0 : i32, i32
  }
  func.func @transform_5(%arg0: i32) -> (i32, i32) {
    %c0_i32 = arith.constant 0 : i32
    %c0_i32_0 = arith.constant 0 : i32
    %c0_i32_1 = arith.constant 0 : i32
    return %c0_i32, %c0_i32_0 : i32, i32
  }
  func.func @transform_6(%arg0: i32) -> (i32, i32) {
    %c0_i32 = arith.constant 0 : i32
    %c0_i32_0 = arith.constant 0 : i32
    %c0_i32_1 = arith.constant 0 : i32
    return %c0_i32, %c0_i32_0 : i32, i32
  }
  func.func @transform_7(%arg0: i32) -> (i32, i32) {
    %c0_i32 = arith.constant 0 : i32
    %c0_i32_0 = arith.constant 0 : i32
    return %arg0, %c0_i32 : i32, i32
  }
}

</mosaic_0001>

<bundles_post_ra>
// kernel: policy_net_forward.1
= control target key start
LH: loop header
LB: loop body
LE: loop exit
PB: predicated region body
PF: predicated region fallthrough
CT: control target
= control target key end

     0   :  { %s372_s1 = inlined_call_operand.vmem [shape: f32[128,128], index: 1, kind: input, shape index: {}]   ;;  %s373_s3 = inlined_call_operand.vmem [shape: f32[128,128], index: 3, kind: input, shape index: {}]   ;;  %s374_s2 = inlined_call_operand.vmem [shape: f32[1,128], index: 2, kind: input, shape index: {}]   ;;  %s375_s0 = inlined_call_operand.vmem [shape: f32[8,128], index: 0, kind: input, shape index: {}]   ;;  %s376_s4 = inlined_call_operand.vmem [shape: f32[1,128], index: 4, kind: input, shape index: {}]   ;;  %s377_s5 = inlined_call_operand.vmem [shape: f32[128,128], index: 5, kind: input, shape index: {}]   ;;  %s378_s6 = inlined_call_operand.vmem [shape: f32[1,128], index: 6, kind: input, shape index: {}]   ;;  %s379_s7 = inlined_call_operand.vmem [shape: f32[8,128], index: 7, kind: output, shape index: {}]  }
   0x1   :  { %v42_v0 = vld [vmem:[%s372_s1 + $0x78] sm:$0xff]  ;;  %v41_v1 = vld [vmem:[%s372_s1 + $0x70] sm:$0xff]  ;;  %v40_v2 = vld [vmem:[%s372_s1 + $0x68] sm:$0xff] }
   0x2   :  { %47 = vmatpush.msra.mxu0 %v42_v0  ;;  %v39_v3 = vld [vmem:[%s372_s1 + $0x60] sm:$0xff]  ;;  %v83_v4 = vld [vmem:[%s373_s3 + $0x78] sm:$0xff]  ;;  %v82_v6 = vld [vmem:[%s373_s3 + $0x70] sm:$0xff] }
   0x3   :  { %v38_v5 = vld [vmem:[%s372_s1 + $0x58] sm:$0xff]  ;;  %88 = vmatpush.msra.mxu1 %v83_v4  ;;  %v81_v7 = vld [vmem:[%s373_s3 + $0x68] sm:$0xff]  ;;  %v37_v8 = vld [vmem:[%s372_s1 + $0x50] sm:$0xff] }
   0x4   :  { %48 = vmatpush.msra.mxu0 %v41_v1  ;;  %v80_v9 = vld [vmem:[%s373_s3 + $0x60] sm:$0xff]  ;;  %v36_v10 = vld [vmem:[%s372_s1 + $0x48] sm:$0xff]  ;;  %v79_v11 = vld [vmem:[%s373_s3 + $0x58] sm:$0xff] }
   0x5   :  { %89 = vmatpush.msra.mxu1 %v82_v6  ;;  %v35_v12 = vld [vmem:[%s372_s1 + $0x40] sm:$0xff]  ;;  %v78_v13 = vld [vmem:[%s373_s3 + $0x50] sm:$0xff]  ;;  %v34_v14 = vld [vmem:[%s372_s1 + $0x38] sm:$0xff] }
   0x6   :  { %49 = vmatpush.msra.mxu0 %v40_v2  ;;  %v77_v15 = vld [vmem:[%s373_s3 + $0x48] sm:$0xff]  ;;  %v33_v16 = vld [vmem:[%s372_s1 + $0x30] sm:$0xff]  ;;  %v76_v17 = vld [vmem:[%s373_s3 + $0x40] sm:$0xff] }
   0x7   :  { %90 = vmatpush.msra.mxu1 %v81_v7  ;;  %v32_v18 = vld [vmem:[%s372_s1 + $0x28] sm:$0xff]  ;;  %v75_v19 = vld [vmem:[%s373_s3 + $0x38] sm:$0xff]  ;;  %v31_v20 = vld [vmem:[%s372_s1 + $0x20] sm:$0xff] }
   0x8   :  { %50 = vmatpush.msra.mxu0 %v39_v3  ;;  %v74_v21 = vld [vmem:[%s373_s3 + $0x30] sm:$0xff]  ;;  %v30_v22 = vld [vmem:[%s372_s1 + $0x18] sm:$0xff]  ;;  %v73_v23 = vld [vmem:[%s373_s3 + $0x28] sm:$0xff] }
   0x9   :  { %91 = vmatpush.msra.mxu1 %v80_v9  ;;  %v29_v24 = vld [vmem:[%s372_s1 + $0x10] sm:$0xff]  ;;  %v72_v25 = vld [vmem:[%s373_s3 + $0x20] sm:$0xff]  ;;  %v28_v26 = vld [vmem:[%s372_s1 + $0x8] sm:$0xff] }
   0xa   :  { %51 = vmatpush.msra.mxu0 %v38_v5  ;;  %v71_v27 = vld [vmem:[%s373_s3 + $0x18] sm:$0xff]  ;;  %v27_v28 = vld [vmem:[%s372_s1] sm:$0xff]  ;;  %v70_v30 = vld [vmem:[%s373_s3 + $0x10] sm:$0xff] }
   0xb   :  { %92 = vmatpush.msra.mxu1 %v79_v11  ;;  %v26_v29 = vld [vmem:[%s375_s0] sm:$0xff]  ;;  %v69_v31 = vld [vmem:[%s373_s3 + $0x8] sm:$0xff]  ;;  %v124_v33 = vld [vmem:[%s377_s5 + $0x78] sm:$0xff] }
   0xc   :  { %52 = vmatpush.msra.mxu0 %v37_v8  ;;  %v68_v32 = vld [vmem:[%s373_s3] sm:$0xff]  ;;  %v123_v34 = vld [vmem:[%s377_s5 + $0x70] sm:$0xff]  ;;  %129 = vmatpush.msra.mxu2 %v124_v33  ;;  %v122_v35 = vld [vmem:[%s377_s5 + $0x68] sm:$0xff] }
   0xd   :  { %93 = vmatpush.msra.mxu1 %v78_v13  ;;  %v121_v36 = vld [vmem:[%s377_s5 + $0x60] sm:$0xff]  ;;  %v120_v37 = vld [vmem:[%s377_s5 + $0x58] sm:$0xff]  ;;  %v119_v38 = vld [vmem:[%s377_s5 + $0x50] sm:$0xff] }
   0xe   :  { %53 = vmatpush.msra.mxu0 %v36_v10  ;;  %130 = vmatpush.msra.mxu2 %v123_v34  ;;  %v118_v39 = vld [vmem:[%s377_s5 + $0x48] sm:$0xff]  ;;  %v117_v40 = vld [vmem:[%s377_s5 + $0x40] sm:$0xff]  ;;  %v116_v41 = vld [vmem:[%s377_s5 + $0x38] sm:$0xff] }
   0xf   :  { %94 = vmatpush.msra.mxu1 %v77_v15  ;;  %v115_v42 = vld [vmem:[%s377_s5 + $0x30] sm:$0xff]  ;;  %v114_v43 = vld [vmem:[%s377_s5 + $0x28] sm:$0xff]  ;;  %v113_v44 = vld [vmem:[%s377_s5 + $0x20] sm:$0xff] }
  0x10   :  { %54 = vmatpush.msra.mxu0 %v35_v12  ;;  %131 = vmatpush.msra.mxu2 %v122_v35  ;;  %v112_v45 = vld [vmem:[%s377_s5 + $0x18] sm:$0xff]  ;;  %v166_v46 = vld [vmem:[%s374_s2] ss:$0 sm:$0xff]  ;;  %v111_v50 = vld [vmem:[%s377_s5 + $0x10] sm:$0xff] }
  0x11   :  { %95 = vmatpush.msra.mxu1 %v76_v17  ;;  %v110_v51 = vld [vmem:[%s377_s5 + $0x8] sm:$0xff]  ;;  %v109_v52 = vld [vmem:[%s377_s5] sm:$0xff] }
  0x12   :  { %55 = vmatpush.msra.mxu0 %v34_v14  ;;  %132 = vmatpush.msra.mxu2 %v121_v36  ;;  %v167_v53 = vld [vmem:[%s376_s4] ss:$0 sm:$0xff] }
  0x13   :  { %96 = vmatpush.msra.mxu1 %v75_v19  ;;  %v168_v57 = vld [vmem:[%s378_s6] ss:$0 sm:$0xff] }
  0x14   :  { %56 = vmatpush.msra.mxu0 %v33_v16  ;;  %133 = vmatpush.msra.mxu2 %v120_v37 }
  0x15   :  { %97 = vmatpush.msra.mxu1 %v74_v21 }
  0x16   :  { %57 = vmatpush.msra.mxu0 %v32_v18  ;;  %134 = vmatpush.msra.mxu2 %v119_v38 }
  0x17   :  { %98 = vmatpush.msra.mxu1 %v73_v23 }
  0x18   :  { %58 = vmatpush.msra.mxu0 %v31_v20  ;;  %135 = vmatpush.msra.mxu2 %v118_v39 }
  0x19   :  { %99 = vmatpush.msra.mxu1 %v72_v25 }
  0x1a   :  { %59 = vmatpush.msra.mxu0 %v30_v22  ;;  %136 = vmatpush.msra.mxu2 %v117_v40 }
  0x1b   :  { %100 = vmatpush.msra.mxu1 %v71_v27 }
  0x1c   :  { %60 = vmatpush.msra.mxu0 %v29_v24  ;;  %137 = vmatpush.msra.mxu2 %v116_v41 }
  0x1d   :  { %101 = vmatpush.msra.mxu1 %v70_v30 }
  0x1e   :  { %61 = vmatpush.msra.mxu0 %v28_v26  ;;  %138 = vmatpush.msra.mxu2 %v115_v42 }
  0x1f   :  { %102 = vmatpush.msra.mxu1 %v69_v31 }
  0x20   :  { %62 = vmatpush.msra.mxu0 %v27_v28  ;;  %139 = vmatpush.msra.mxu2 %v114_v43 }
  0x21   :  { %63 = vmatmul.f32.vlgmr.msra.gmra.mxu0 %v26_v29  ;;  %103 = vmatpush.msra.mxu1 %v68_v32 }
  0x22   :  { %140 = vmatpush.msra.mxu2 %v113_v44 }
  0x24   :  { %141 = vmatpush.msra.mxu2 %v112_v45 }
  0x26   :  { %142 = vmatpush.msra.mxu2 %v111_v50 }
  0x28   :  { %143 = vmatpush.msra.mxu2 %v110_v51 }
  0x2a   :  { %144 = vmatpush.msra.mxu2 %v109_v52 }
  0x9e   :  { %v64_v47 = vpop.f32.mrf.mxu0 }
  0x9f   :  { %v65_v48 = vadd.f32 %v166_v46, %v64_v47 }
  0xa1   :  { %v67_v49 = vmax.f32 %v65_v48, 0.0 }
  0xa3   :  { %104 = vmatmul.f32.vlgmr.msra.gmra.mxu1 %v67_v49 }
 0x120   :  { %v105_v54 = vpop.f32.mrf.mxu1 }
 0x121   :  { %v106_v55 = vadd.f32 %v167_v53, %v105_v54 }
 0x123   :  { %v108_v56 = vmax.f32 %v106_v55, 0.0 }
 0x125   :  { %145 = vmatmul.f32.vlgmr.msra.gmra.mxu2 %v108_v56 }
 0x1a8   :  { %v146_v58 = vpop.f32.mrf.mxu2 }
 0x1a9   :  { %v147_v59 = vadd.f32 %v168_v57, %v146_v58 }
 0x1ab   :  { %149 = vmax.xlane.f32.xlu0 %v147_v59 }
 0x21e   :  { %v150_v60 = vpop.xlane.xlu0 %149 }
 0x21f   :  { %v151_v61 = vsub.f32 %v147_v59, %v150_v60 }
 0x221   :  { %v152_v62 = vmul.f32 1.442695, %v151_v61 }
 0x223   :  { %169 = vpow2.f32 %v152_v62 }
 0x229   :  { %v170_v63 = vpop.eup %169 }
 0x22a   :  { %154 = vadd.xlane.f32.xlu0 %v170_v63 }
 0x29d   :  { %v155_v0 = vpop.xlane.xlu0 %154 }
 0x29e   :  { %171 = vrcp.f32 %v155_v0 }
 0x2a4   :  { %v172_v1 = vpop.eup %171 }
 0x2a5   :  { %v157_v2 = vmul.f32 %v172_v1, %v155_v0 }
 0x2a7   :  { %v158_v3 = vsub.f32 2.0, %v157_v2 }
 0x2a9   :  { %v159_v4 = vmul.f32 %v172_v1, %v158_v3 }
 0x2ab   :  { %v160_v5 = vmul.f32 %v170_v63, %v159_v4 }
 0x2ad   :  { %161 = vst [vmem:[%s379_s7] sm:$0xff] %v160_v5 }

</bundles_post_ra>
